<compile_context>
chip_gen: v7x
topology: tpu7x:2x2x1
jax: 0.10.0
libtpu: 0.0.40
codegen_flags: <defaults>
</compile_context>

<pallas_src>
import jax
import jax.numpy as jnp
from jax import lax
from jax.experimental import pallas as pl
from jax.experimental.pallas import tpu as pltpu


def _round_up(x: int, m: int) -> int:
    return ((x + m - 1) // m) * m


def _linear_kernel(x_ref, w_ref, c_ref):
    # combine = F.linear(x, W) = x @ W.T
    # Contract the last dim of both operands -> no transpose copy before the MXU.
    c = lax.dot_general(
        x_ref[...], w_ref[...],
        dimension_numbers=(((1,), (1,)), ((), ())),
        preferred_element_type=jnp.float32)
    c_ref[...] = c.astype(c_ref.dtype)


def _adj_tile_kernel(ci_ref, cj_ref, out_ref):
    # logits_tile = C_i @ C_j.T  (contract last dims of both -> no XLU transpose)
    logits = lax.dot_general(
        ci_ref[...], cj_ref[...],
        dimension_numbers=(((1,), (1,)), ((), ())),
        preferred_element_type=jnp.float32)
    # sigmoid epilogue: exp rides the EUP slot; exact reciprocal keeps numerics tight.
    out_ref[...] = (1.0 / (1.0 + jnp.exp(-logits))).astype(out_ref.dtype)


def decoder_forward(node_embed: jax.Array, de_weight: jax.Array,
                    *, compute_dtype=None, tile: int | None = None) -> jax.Array:
    """sigmoid((x @ W^T) @ (x @ W^T)^T), tiled for TPU VMEM."""
    n, e = node_embed.shape
    assert de_weight.shape == (e, e)
    out_dtype = node_embed.dtype

    # Optional low-precision MXU operands (bf16 on v6e/v7x); accumulation stays f32.
    if compute_dtype is not None:
        node_embed = node_embed.astype(compute_dtype)
        de_weight = de_weight.astype(compute_dtype)
    cdt = node_embed.dtype

    # Lane-dense output tiles: multiples of 128; larger tiles for larger N.
    # A (512, 512) f32 tile is 1 MiB (2 MiB double-buffered) -> safe on v5e/v6e/v7x.
    if tile is None:
        if n >= 512:
            tile = 512
        elif n >= 256:
            tile = 256
        else:
            tile = 128
    n_pad = _round_up(n, tile)
    if n_pad != n:
        node_embed = jnp.pad(node_embed, ((0, n_pad - n), (0, 0)))

    # ---- Stage 1: combine = x @ W.T  -> (N_pad, E), tiled over rows. ----
    combine = pl.pallas_call(
        _linear_kernel,
        out_shape=jax.ShapeDtypeStruct((n_pad, e), cdt),
        grid_spec=pltpu.PrefetchScalarGridSpec(
            num_scalar_prefetch=0,
            grid=(n_pad // tile,),
            in_specs=[
                pl.BlockSpec((tile, e), lambda i: (i, 0)),
                pl.BlockSpec((e, e), lambda i: (0, 0)),
            ],
            out_specs=pl.BlockSpec((tile, e), lambda i: (i, 0)),
        ),
        compiler_params=pltpu.CompilerParams(
            dimension_semantics=("parallel",)),
    )(node_embed, de_weight)

    # ---- Stage 2: adj = sigmoid(combine @ combine.T), tiled (tile, tile). ----
    adj = pl.pallas_call(
        _adj_tile_kernel,
        out_shape=jax.ShapeDtypeStruct((n_pad, n_pad), out_dtype),
        grid_spec=pltpu.PrefetchScalarGridSpec(
            num_scalar_prefetch=0,
            grid=(n_pad // tile, n_pad // tile),
            in_specs=[
                pl.BlockSpec((tile, e), lambda i, j: (i, 0)),   # C_i rows
                pl.BlockSpec((tile, e), lambda i, j: (j, 0)),   # C_j rows
            ],
            out_specs=pl.BlockSpec((tile, tile), lambda i, j: (i, j)),
        ),
        compiler_params=pltpu.CompilerParams(
            dimension_semantics=("parallel", "parallel")),
    )(combine, combine)

    if n_pad != n:
        adj = adj[:n, :n]
    return adj


def decoder_reference(node_embed: jax.Array, de_weight: jax.Array) -> jax.Array:
    combine = node_embed @ de_weight.T
    return jax.nn.sigmoid(combine @ combine.T)


if __name__ == "__main__":
    key = jax.random.PRNGKey(0)
    k_x, k_w, k_x2 = jax.random.split(key, 3)

    # Small shapes consistent with the module: N nodes, nembed features.
    N, NEMBED = 8, 32

    # Deterministic parameter init matching reset_parameters():
    # uniform(-stdv, stdv) with stdv = 1/sqrt(nembed)
    stdv = 1.0 / (NEMBED ** 0.5)
    de_weight = jax.random.uniform(
        k_w, (NEMBED, NEMBED), dtype=jnp.float32, minval=-stdv, maxval=stdv)

    node_embed = jax.random.normal(k_x, (N, NEMBED), dtype=jnp.float32)

    # NOTE: forward() never applies self.dropout, so none is applied here either.
    adj_out = jax.block_until_ready(decoder_forward(node_embed, de_weight))
    ref = decoder_reference(node_embed, de_weight)
    assert adj_out.shape == (N, N)
    assert jnp.allclose(adj_out, ref, atol=1e-5, rtol=1e-5), "mismatch vs reference (small)"

    # Exercise the multi-tile path (padding + 2x2 output-tile grid).
    N2 = 300
    node_embed2 = jax.random.normal(k_x2, (N2, NEMBED), dtype=jnp.float32)
    adj_out2 = jax.block_until_ready(decoder_forward(node_embed2, de_weight))
    ref2 = decoder_reference(node_embed2, de_weight)
    assert adj_out2.shape == (N2, N2)
    assert jnp.allclose(adj_out2, ref2, atol=1e-5, rtol=1e-5), "mismatch vs reference (tiled)"

    print("KERNEL_OK")
</pallas_src>

<mosaic_0001>
module attributes {stable_mosaic.version = 11 : i64} {
  func.func @_linear_kernel(%arg0: i32, %arg1: memref<128x32xf32, #tpu.memory_space<vmem>>, %arg2: memref<32x32xf32, #tpu.memory_space<vmem>>, %arg3: memref<128x32xf32, #tpu.memory_space<vmem>>) attributes {dimension_semantics = [#tpu.dimension_semantics<parallel>], iteration_bounds = array<i64: 1>, scalar_prefetch = 0 : i64, scratch_operands = 0 : i64, tpu.core_type = #tpu.core_type<tc>, window_params = [{transform_indices = @transform_0, window_bounds = array<i64: 128, 32>}, {pipeline_mode = #tpu.pipeline_mode<synchronous>, transform_indices = @transform_1, window_bounds = array<i64: 32, 32>}, {transform_indices = @transform_2, window_bounds = array<i64: 128, 32>}]} {
    %c0 = arith.constant 0 : index
    %c0_0 = arith.constant 0 : index
    %0 = vector.load %arg1[%c0, %c0_0] : memref<128x32xf32, #tpu.memory_space<vmem>>, vector<128x32xf32>
    %c0_1 = arith.constant 0 : index
    %c0_2 = arith.constant 0 : index
    %1 = vector.load %arg2[%c0_1, %c0_2] : memref<32x32xf32, #tpu.memory_space<vmem>>, vector<32x32xf32>
    %cst = arith.constant dense<0.000000e+00> : vector<128x32xf32>
    %2 = tpu.matmul %0, %1, %cst {dimension_numbers = #tpu.dot_dimension_numbers<[1], [1], [0], [0], [0, 0, 1, 0], [], []>} : vector<128x32xf32>, vector<32x32xf32>, vector<128x32xf32> -> vector<128x32xf32>
    %c0_3 = arith.constant 0 : index
    %c0_4 = arith.constant 0 : index
    %3 = vector.load %arg3[%c0_3, %c0_4] : memref<128x32xf32, #tpu.memory_space<vmem>>, vector<128x32xf32>
    tpu.vector_store %arg3[%c0_3, %c0_4], %2 {strides = array<i32>} : memref<128x32xf32, #tpu.memory_space<vmem>>, vector<128x32xf32>,
    return
  }
  func.func @transform_0(%arg0: i32) -> (i32, i32) {
    %c0_i32 = arith.constant 0 : i32
    %c0_i32_0 = arith.constant 0 : i32
    return %arg0, %c0_i32 : i32, i32
  }
  func.func @transform_1(%arg0: i32) -> (i32, i32) {
    %c0_i32 = arith.constant 0 : i32
    %c0_i32_0 = arith.constant 0 : i32
    %c0_i32_1 = arith.constant 0 : i32
    return %c0_i32, %c0_i32_0 : i32, i32
  }
  func.func @transform_2(%arg0: i32) -> (i32, i32) {
    %c0_i32 = arith.constant 0 : i32
    %c0_i32_0 = arith.constant 0 : i32
    return %arg0, %c0_i32 : i32, i32
  }
}

</mosaic_0001>

<bundles_post_ra>
// kernel: tpu_custom_call.1
= control target key start
LH: loop header
LB: loop body
LE: loop exit
PB: predicated region body
PF: predicated region fallthrough
CT: control target
= control target key end

     0   :  { %vm31_vm0 = vcmask 261120   ;;  %s522_s1 = inlined_call_operand.vmem [shape: f32[32,32], index: 1, kind: input, shape index: {}]   ;;  %s523_s0 = inlined_call_operand.vmem [shape: f32[128,32], index: 0, kind: input, shape index: {}]   ;;  %s524_s2 = inlined_call_operand.vmem [shape: f32[128,32], index: 2, kind: output, shape index: {}]  }
   0x1   :  { %v27_v0 = vld [vmem:[%s522_s1] sm:$0xff]  ;;  %v28_v1 = vld [vmem:[%s522_s1 + $0x8] sm:$0xff]  ;;  %vm368_vm1 = vmpackc.low %vm31_vm0, %vm31_vm0 }
   0x2   :  { %v329_v3 = vpack.c.bf16 %v28_v1, %v27_v0  ;;  %v29_v4 = vld [vmem:[%s522_s1 + $0x10] sm:$0xff]  ;;  %v30_v5 = vld [vmem:[%s522_s1 + $0x18] sm:$0xff]  ;;  %v11_v6 = vld [vmem:[%s523_s0] sm:$0xff] }
   0x3   :  { %v335_v7 = vpack.c.bf16 %v30_v5, %v29_v4  ;;  %305 = vmatprep.mubr.msk.f32.mxu0 %vm31_vm0, %v11_v6  ;;  %v19_v8 = vld [vmem:[%s523_s0 + $0x40] sm:$0xff]  ;;  %v12_v9 = vld [vmem:[%s523_s0 + $0x8] sm:$0xff]  ;;  %v13_v11 = vld [vmem:[%s523_s0 + $0x10] sm:$0xff] }
   0x4   :  { %331 = vmatprep.subr.msk.bf16.mxu0 %vm368_vm1, %v329_v3  ;;  %341 = vmatprep.subr.msk.bf16.mxu1 %vm368_vm1, %v329_v3  ;;  %v20_v10 = vld [vmem:[%s523_s0 + $0x48] sm:$0xff]  ;;  %v21_v12 = vld [vmem:[%s523_s0 + $0x50] sm:$0xff]  ;;  %v14_v13 = vld [vmem:[%s523_s0 + $0x18] sm:$0xff] }
   0x5   :  { %334 = vmatpush3.bf16.xpose.msk.msra.mxu0 %vm368_vm1, %v329_v3  ;;  %343 = vmatpush3.bf16.xpose.msk.msra.mxu1 %vm368_vm1, %v329_v3  ;;  %v22_v14 = vld [vmem:[%s523_s0 + $0x58] sm:$0xff]  ;;  %v15_v15 = vld [vmem:[%s523_s0 + $0x20] sm:$0xff]  ;;  %v16_v17 = vld [vmem:[%s523_s0 + $0x28] sm:$0xff] }
   0x6   :  { %337 = vmatprep.subr.msk.bf16.mxu0 %vm368_vm1, %v335_v7  ;;  %342 = vmatprep.subr.msk.bf16.mxu1 %vm368_vm1, %v335_v7  ;;  %v23_v16 = vld [vmem:[%s523_s0 + $0x60] sm:$0xff]  ;;  %v24_v18 = vld [vmem:[%s523_s0 + $0x68] sm:$0xff]  ;;  %v17_v19 = vld [vmem:[%s523_s0 + $0x30] sm:$0xff] }
   0x7   :  { %317 = vmatprep.mubr.msk.f32.mxu1 %vm31_vm0, %v19_v8  ;;  %v25_v20 = vld [vmem:[%s523_s0 + $0x70] sm:$0xff]  ;;  %v18_v21 = vld [vmem:[%s523_s0 + $0x38] sm:$0xff] }
   0x8   :  { %v26_v22 = vld [vmem:[%s523_s0 + $0x78] sm:$0xff] }
   0xd   :  { %340 = vmatpush3.bf16.xpose.msk.msra.mxu0 %vm368_vm1, %v335_v7  ;;  %344 = vmatpush3.bf16.xpose.msk.msra.mxu1 %vm368_vm1, %v335_v7 }
  0x14   :  { %306 = vmatmul.mubr.msk.f32.vlgmr.msra.gmra.mrb[0].mxu0 %vm31_vm0, %v12_v9  ;;  %318 = vmatmul.mubr.msk.f32.vlgmr.msra.gmra.mrb[0].mxu1 %vm31_vm0, %v20_v10 }
  0x15   :  { %308 = vmatprep.mubr.msk.f32.mxu0 %vm31_vm0, %v13_v11  ;;  %320 = vmatprep.mubr.msk.f32.mxu1 %vm31_vm0, %v21_v12 }
  0x18   :  { %309 = vmatmul.mubr.msk.f32.gmra.mrb[2].mxu0 %vm31_vm0, %v14_v13  ;;  %321 = vmatmul.mubr.msk.f32.gmra.mrb[2].mxu1 %vm31_vm0, %v22_v14 }
  0x19   :  { %311 = vmatprep.mubr.msk.f32.mxu0 %vm31_vm0, %v15_v15  ;;  %323 = vmatprep.mubr.msk.f32.mxu1 %vm31_vm0, %v23_v16 }
  0x1c   :  { %312 = vmatmul.mubr.msk.f32.gmra.mrb[4].mxu0 %vm31_vm0, %v16_v17  ;;  %324 = vmatmul.mubr.msk.f32.gmra.mrb[4].mxu1 %vm31_vm0, %v24_v18 }
  0x1d   :  { %314 = vmatprep.mubr.msk.f32.mxu0 %vm31_vm0, %v17_v19  ;;  %326 = vmatprep.mubr.msk.f32.mxu1 %vm31_vm0, %v25_v20 }
  0x20   :  { %315 = vmatmul.mubr.msk.f32.gmra.mrb[6].mxu0 %vm31_vm0, %v18_v21  ;;  %327 = vmatmul.mubr.msk.f32.gmra.mrb[6].mxu1 %vm31_vm0, %v26_v22 }
  0xe7   :  { %v307_v23 = vpop.f32.mrb[0].mxu0  ;;  %v319_v24 = vpop.f32.mrb[0].mxu1 }
  0xe8   :  { %238 = vst.msk [vmem:[%s524_s2 + $0x8] sm:$0xff] %vm31_vm0, %v307_v23  ;;  %246 = vst.msk [vmem:[%s524_s2 + $0x48] sm:$0xff] %vm31_vm0, %v319_v24  ;;  %v158_v25 = vpop.f32.mrb[1].mxu0  ;;  %v198_v26 = vpop.f32.mrb[1].mxu1 }
  0xe9   :  { %237 = vst.msk [vmem:[%s524_s2] sm:$0xff] %vm31_vm0, %v158_v25  ;;  %245 = vst.msk [vmem:[%s524_s2 + $0x40] sm:$0xff] %vm31_vm0, %v198_v26 }
  0xeb   :  { %v310_v27 = vpop.f32.mrb[2].mxu0  ;;  %v322_v28 = vpop.f32.mrb[2].mxu1 }
  0xec   :  { %240 = vst.msk [vmem:[%s524_s2 + $0x18] sm:$0xff] %vm31_vm0, %v310_v27  ;;  %248 = vst.msk [vmem:[%s524_s2 + $0x58] sm:$0xff] %vm31_vm0, %v322_v28  ;;  %v168_v29 = vpop.f32.mrb[3].mxu0  ;;  %v208_v30 = vpop.f32.mrb[3].mxu1 }
  0xed   :  { %239 = vst.msk [vmem:[%s524_s2 + $0x10] sm:$0xff] %vm31_vm0, %v168_v29  ;;  %247 = vst.msk [vmem:[%s524_s2 + $0x50] sm:$0xff] %vm31_vm0, %v208_v30 }
  0xef   :  { %v313_v31 = vpop.f32.mrb[4].mxu0  ;;  %v325_v32 = vpop.f32.mrb[4].mxu1 }
  0xf0   :  { %242 = vst.msk [vmem:[%s524_s2 + $0x28] sm:$0xff] %vm31_vm0, %v313_v31  ;;  %250 = vst.msk [vmem:[%s524_s2 + $0x68] sm:$0xff] %vm31_vm0, %v325_v32  ;;  %v178_v33 = vpop.f32.mrb[5].mxu0  ;;  %v218_v34 = vpop.f32.mrb[5].mxu1 }
  0xf1   :  { %241 = vst.msk [vmem:[%s524_s2 + $0x20] sm:$0xff] %vm31_vm0, %v178_v33  ;;  %249 = vst.msk [vmem:[%s524_s2 + $0x60] sm:$0xff] %vm31_vm0, %v218_v34 }
  0xf3   :  { %v316_v35 = vpop.f32.mrb[6].mxu0  ;;  %v328_v36 = vpop.f32.mrb[6].mxu1 }
  0xf4   :  { %244 = vst.msk [vmem:[%s524_s2 + $0x38] sm:$0xff] %vm31_vm0, %v316_v35  ;;  %252 = vst.msk [vmem:[%s524_s2 + $0x78] sm:$0xff] %vm31_vm0, %v328_v36  ;;  %v188_v37 = vpop.f32.mrb[7].mxu0  ;;  %v228_v38 = vpop.f32.mrb[7].mxu1 }
  0xf5   :  { %243 = vst.msk [vmem:[%s524_s2 + $0x30] sm:$0xff] %vm31_vm0, %v188_v37  ;;  %251 = vst.msk [vmem:[%s524_s2 + $0x70] sm:$0xff] %vm31_vm0, %v228_v38 }

</bundles_post_ra>
